<compile_context>
chip_gen: v6e
topology: v6e:2x2x1
jax: 0.10.0
libtpu: 0.0.40
codegen_flags: <defaults>
</compile_context>

<pallas_src>
import functools

import jax
import jax.numpy as jnp
from jax import lax
from jax.experimental import pallas as pl
from jax.experimental.pallas import tpu as pltpu


def _round_up(x, m):
    return ((x + m - 1) // m) * m


def _proxy_anchor_kernel(emb_ref, lab_ref, prox_hbm, out_ref,
                         prox_nT_ref, pos_acc_ref, neg_acc_ref, dma_sem,
                         *, margin, alpha, num_classes, matmul_dtype):
    step = pl.program_id(1)           # batch-tile step within this core

    # --- one-time init (per core): fetch + normalize proxies, zero accumulators.
    @pl.when(step == 0)
    def _init():
        cp = pltpu.make_async_copy(prox_hbm, prox_nT_ref, dma_sem)
        cp.start()
        cp.wait()
        p = prox_nT_ref[...]                                   # (Epad, Cpad) f32
        # F.normalize: x / max(||x||, 1e-12) == x * rsqrt(max(sumsq, 1e-24))
        inv_p = lax.rsqrt(jnp.maximum(jnp.sum(p * p, axis=0, keepdims=True),
                                      1e-24))
        prox_nT_ref[...] = p * inv_p
        pos_acc_ref[...] = jnp.zeros_like(pos_acc_ref)
        neg_acc_ref[...] = jnp.zeros_like(neg_acc_ref)

    # --- per batch-tile work --------------------------------------------------
    emb = emb_ref[...]                                         # (TB, Epad) f32
    inv_e = lax.rsqrt(jnp.maximum(jnp.sum(emb * emb, axis=-1, keepdims=True),
                                  1e-24))
    emb_n = emb * inv_e

    # Canonical A @ B on the MXU (proxies already transposed to (Epad, Cpad)).
    cos = lax.dot_general(emb_n.astype(matmul_dtype),
                          prox_nT_ref[...].astype(matmul_dtype),
                          dimension_numbers=(((1,), (0,)), ((), ())),
                          preferred_element_type=jnp.float32)  # (TB, Cpad)

    labels = lab_ref[...]                                      # (TB, 1) int32, -1 = pad
    cls = lax.broadcasted_iota(jnp.int32, cos.shape, 1)
    pos_mask = cls == labels                                   # padded rows never match
    valid = (cls < num_classes) & (labels >= 0)                # padded classes / rows

    # Single exp pass; invalid lanes/rows get exp(-1e30) == 0, so no neg_mask.
    s = jnp.where(pos_mask, -alpha * (cos - margin), alpha * (cos + margin))
    s = jnp.where(valid, s, -1e30)
    e = jnp.exp(s)

    pos_e = jnp.where(pos_mask, e, 0.0)
    neg_e = e - pos_e                                          # exact: e or 0 per element

    # Lane-dense partial rows; only sublane reductions in the hot loop.
    pos_acc_ref[...] += jnp.sum(pos_e, axis=0, keepdims=True)
    neg_acc_ref[...] += jnp.sum(neg_e, axis=0, keepdims=True)

    # --- finalize on this core's last batch tile -------------------------------
    @pl.when(step == pl.num_programs(1) - 1)
    def _fin():
        pos_s = jnp.sum(pos_acc_ref[...])                      # one cross-lane reduce
        neg_s = jnp.sum(neg_acc_ref[...])
        sub = lax.broadcasted_iota(jnp.int32, out_ref.shape, 0)
        lane = lax.broadcasted_iota(jnp.int32, out_ref.shape, 1)
        out_ref[...] = jnp.where((sub == 0) & (lane == 0), pos_s,
                                 jnp.where((sub == 0) & (lane == 1), neg_s, 0.0))


def proxy_anchor_loss(embeddings, proxies, labels, *, margin=0.1, alpha=32.0,
                      num_cores=1, matmul_dtype=jnp.float32,
                      vmem_budget_bytes=48 * 1024 * 1024):
    """Forward of the PyTorch ProxyAnchorLoss module.

    num_cores: set to 2 on v7x (dual TensorCore) — leading grid axis is
      'parallel'; per-core partial sums are combined (before the log) here.
    matmul_dtype: jnp.bfloat16 recommended on v6e/v7x for E >= 256 (3-4x MXU
      throughput); default f32 because alpha=32 amplifies cosine error.
    """
    B, E = embeddings.shape
    C, E2 = proxies.shape
    assert E == E2, "embedding dims must match"

    LANE = 128
    # TODO(synk): round Epad/Cpad up to 256 on v6e/v7x (2x256^2 MXU) when E,C > 128.
    Epad = _round_up(E, LANE)
    Cpad = _round_up(C, LANE)

    # --- derive the batch tile from an explicit VMEM budget --------------------
    slab_bytes = Epad * Cpad * 4                       # resident normalized proxies (1 copy)
    acc_bytes = 2 * Cpad * 4
    fixed = slab_bytes + acc_bytes + (256 << 10)       # + headroom
    # per batch row: double-buffered f32 embedding tile + ~3 (row, Cpad) f32
    # temporaries (cos / exp / pos_e) + labels.
    per_row = 2 * Epad * 4 + 3 * Cpad * 4 + 2 * 4
    avail = vmem_budget_bytes - fixed
    if avail < per_row * 8:
        # TODO(synk): class-tile the proxy slab (extra C grid axis) when
        # Cpad*Epad*4 approaches the VMEM budget (large C on v7x).
        tb_budget = 8
    else:
        tb_budget = min(1024, (avail // per_row) // 8 * 8)
    TB = max(8, min(tb_budget, _round_up(B, 8)))

    tiles = pl.cdiv(B, TB)
    tiles = _round_up(tiles, num_cores)
    tiles_per_core = tiles // num_cores
    Bpad = tiles * TB

    # Zero-pad E/C (harmless for L2 norm and the contraction); padded batch rows
    # get label -1 so they drop out via the `valid` mask.
    emb_p = jnp.zeros((Bpad, Epad), jnp.float32).at[:B, :E].set(
        embeddings.astype(jnp.float32))
    lab_p = jnp.full((Bpad, 1), -1, dtype=jnp.int32).at[:B, 0].set(
        labels.astype(jnp.int32))
    # Proxies stored transposed (Epad, Cpad) so the kernel dot is canonical A@B.
    prox_p = jnp.zeros((Epad, Cpad), jnp.float32).at[:E, :C].set(
        proxies.astype(jnp.float32).T)

    kernel = functools.partial(_proxy_anchor_kernel,
                               margin=float(margin), alpha=float(alpha),
                               num_classes=int(C), matmul_dtype=matmul_dtype)

    partials = pl.pallas_call(
        kernel,
        out_shape=jax.ShapeDtypeStruct((num_cores * 8, 128), jnp.float32),
        grid_spec=pltpu.PrefetchScalarGridSpec(
            num_scalar_prefetch=0,
            grid=(num_cores, tiles_per_core),
            in_specs=[
                pl.BlockSpec((TB, Epad),
                             lambda c, i: (c * tiles_per_core + i, 0)),
                pl.BlockSpec((TB, 1),
                             lambda c, i: (c * tiles_per_core + i, 0)),
                pl.BlockSpec(memory_space=pl.ANY),   # proxies: raw HBM, manual DMA
            ],
            out_specs=pl.BlockSpec((8, 128), lambda c, i: (c, 0)),
            scratch_shapes=[
                pltpu.VMEM((Epad, Cpad), jnp.float32),   # normalized proxies (1 copy)
                pltpu.VMEM((1, Cpad), jnp.float32),      # pos partial row (lane-dense)
                pltpu.VMEM((1, Cpad), jnp.float32),      # neg partial row (lane-dense)
                pltpu.SemaphoreType.DMA(()),             # proxy DMA completion
            ],
        ),
        compiler_params=pltpu.CompilerParams(
            dimension_semantics=("parallel", "arbitrary"),
            vmem_limit_bytes=int(vmem_budget_bytes)),
    )(emb_p, lab_p, prox_p)

    # Cross-core combine must happen before the nonlinear log.
    pos_total = jnp.sum(partials[:, 0])
    neg_total = jnp.sum(partials[:, 1])
    # torch.log(1 + x) (not log1p), matching the reference module exactly.
    return jnp.log(1.0 + pos_total) + jnp.log(1.0 + neg_total)


if __name__ == "__main__":
    # Small shapes implied by the module: batch=8, embedding_size=32, num_classes=8
    B, E, C = 8, 32, 8
    key = jax.random.PRNGKey(0)
    k_emb, k_prox, k_lab = jax.random.split(key, 3)

    embeddings = jax.random.normal(k_emb, (B, E), dtype=jnp.float32)
    # nn.Parameter(torch.randn(C, E)) then kaiming_normal_(mode='fan_out'):
    # fan_out = C, gain = sqrt(2) -> std = sqrt(2 / C)
    proxies = jax.random.normal(k_prox, (C, E), dtype=jnp.float32) * jnp.sqrt(2.0 / C)
    labels = jax.random.randint(k_lab, (B,), 0, C, dtype=jnp.int32)

    # Pure-JAX reference matching the PyTorch module's forward.
    def ref(emb, prox, lab):
        emb_n = emb / jnp.maximum(jnp.linalg.norm(emb, axis=-1, keepdims=True), 1e-12)
        prox_n = prox / jnp.maximum(jnp.linalg.norm(prox, axis=-1, keepdims=True), 1e-12)
        cos = emb_n @ prox_n.T
        oh = jax.nn.one_hot(lab, C, dtype=jnp.float32)
        pos_term = jnp.log(1.0 + jnp.sum(jnp.where(oh > 0, jnp.exp(-32.0 * (cos - 0.1)), 0.0)))
        neg_term = jnp.log(1.0 + jnp.sum(jnp.where(oh == 0, jnp.exp(32.0 * (cos + 0.1)), 0.0)))
        return pos_term + neg_term

    expected = ref(embeddings, proxies, labels)

    # Single-core path (default, f32 MXU).
    loss1 = proxy_anchor_loss(embeddings, proxies, labels, margin=0.1, alpha=32.0)
    jax.block_until_ready(loss1)
    assert jnp.allclose(loss1, expected, rtol=1e-4, atol=1e-4), (loss1, expected)

    # Dual-core partial-sum path (what v7x would use); runs serially on 1-TC chips.
    loss2 = proxy_anchor_loss(embeddings, proxies, labels, num_cores=2)
    jax.block_until_ready(loss2)
    assert jnp.allclose(loss2, expected, rtol=1e-4, atol=1e-4), (loss2, expected)

    # bf16-MXU path (v6e/v7x, large-E recommendation); smoke-test only at E=32.
    loss_bf16 = proxy_anchor_loss(embeddings, proxies, labels,
                                  matmul_dtype=jnp.bfloat16)
    jax.block_until_ready(loss_bf16)
    assert bool(jnp.isfinite(loss_bf16)), loss_bf16

    print("KERNEL_OK")
</pallas_src>

<mosaic_0001>
module attributes {stable_mosaic.version = 11 : i64} {
  func.func @_proxy_anchor_kernel(%arg0: i32, %arg1: i32, %arg2: memref<8x128xf32, #tpu.memory_space<vmem>>, %arg3: memref<8x1xi32, #tpu.memory_space<vmem>>, %arg4: memref<128x128xf32, #tpu.memory_space<any>>, %arg5: memref<8x128xf32, #tpu.memory_space<vmem>>, %arg6: memref<128x128xf32, #tpu.memory_space<vmem>>, %arg7: memref<1x128xf32, #tpu.memory_space<vmem>>, %arg8: memref<1x128xf32, #tpu.memory_space<vmem>>, %arg9: memref<!tpu.dma_semaphore, #tpu.memory_space<semaphore_mem>>) attributes {dimension_semantics = [#tpu.dimension_semantics<parallel>, #tpu.dimension_semantics<arbitrary>], iteration_bounds = array<i64: 1, 1>, scalar_prefetch = 0 : i64, scratch_operands = 4 : i64, tpu.core_type = #tpu.core_type<tc>, window_params = [{transform_indices = @transform_0, window_bounds = array<i64: 8, 128>}, {transform_indices = @transform_1, window_bounds = array<i64: 8, 1>}, {}, {transform_indices = @transform_3, window_bounds = array<i64: 8, 128>}]} {
    %c0_i32 = arith.constant 0 : i32
    %0 = arith.cmpi eq, %arg1, %c0_i32 : i32
    %1 = arith.extui %0 : i1 to i32
    %c0_i32_0 = arith.constant 0 : i32
    %2 = arith.cmpi ne, %1, %c0_i32_0 : i32
    scf.if %2 {
      tpu.enqueue_dma source(%arg4 : memref<128x128xf32, #tpu.memory_space<any>>) target(%arg6 : memref<128x128xf32, #tpu.memory_space<vmem>>) target_semaphore(%arg9 : memref<!tpu.dma_semaphore, #tpu.memory_space<semaphore_mem>>)
      tpu.wait_dma2 semaphore(%arg9 : memref<!tpu.dma_semaphore, #tpu.memory_space<semaphore_mem>>) src(%arg4 : memref<128x128xf32, #tpu.memory_space<any>>) dst(%arg6 : memref<128x128xf32, #tpu.memory_space<vmem>>)
      %c0_27 = arith.constant 0 : index
      %c0_28 = arith.constant 0 : index
      %52 = vector.load %arg6[%c0_27, %c0_28] : memref<128x128xf32, #tpu.memory_space<vmem>>, vector<128x128xf32>
      %53 = arith.mulf %52, %52 : vector<128x128xf32>
      %cst_29 = arith.constant dense<0.000000e+00> : vector<128xf32>
      %54 = vector.multi_reduction <add>, %53, %cst_29 [0] : vector<128x128xf32> to vector<128xf32>
      %55 = vector.shape_cast %54 : vector<128xf32> to vector<1x128xf32>
      %cst_30 = arith.constant 1.000000e-24 : f32
      %56 = vector.broadcast %cst_30 : f32 to vector<1x128xf32>
      %57 = arith.maximumf %55, %56 : vector<1x128xf32>
      %58 = math.rsqrt %57 : vector<1x128xf32>
      %59 = vector.broadcast %58 : vector<1x128xf32> to vector<128x128xf32>
      %60 = arith.mulf %52, %59 : vector<128x128xf32>
      %c0_31 = arith.constant 0 : index
      %c0_32 = arith.constant 0 : index
      %61 = vector.load %arg6[%c0_31, %c0_32] : memref<128x128xf32, #tpu.memory_space<vmem>>, vector<128x128xf32>
      tpu.vector_store %arg6[%c0_31, %c0_32], %60 {strides = array<i32>} : memref<128x128xf32, #tpu.memory_space<vmem>>, vector<128x128xf32>,
      %cst_33 = arith.constant 0.000000e+00 : f32
      %62 = vector.broadcast %cst_33 : f32 to vector<1x128xf32>
      %c0_34 = arith.constant 0 : index
      %c0_35 = arith.constant 0 : index
      %63 = vector.load %arg7[%c0_34, %c0_35] : memref<1x128xf32, #tpu.memory_space<vmem>>, vector<1x128xf32>
      tpu.vector_store %arg7[%c0_34, %c0_35], %62 {strides = array<i32>} : memref<1x128xf32, #tpu.memory_space<vmem>>, vector<1x128xf32>,
      %cst_36 = arith.constant 0.000000e+00 : f32
      %64 = vector.broadcast %cst_36 : f32 to vector<1x128xf32>
      %c0_37 = arith.constant 0 : index
      %c0_38 = arith.constant 0 : index
      %65 = vector.load %arg8[%c0_37, %c0_38] : memref<1x128xf32, #tpu.memory_space<vmem>>, vector<1x128xf32>
      tpu.vector_store %arg8[%c0_37, %c0_38], %64 {strides = array<i32>} : memref<1x128xf32, #tpu.memory_space<vmem>>, vector<1x128xf32>,
    } else {
    }
    %c0 = arith.constant 0 : index
    %c0_1 = arith.constant 0 : index
    %3 = vector.load %arg2[%c0, %c0_1] : memref<8x128xf32, #tpu.memory_space<vmem>>, vector<8x128xf32>
    %4 = arith.mulf %3, %3 : vector<8x128xf32>
    %cst = arith.constant dense<0.000000e+00> : vector<8xf32>
    %5 = vector.multi_reduction <add>, %4, %cst [1] : vector<8x128xf32> to vector<8xf32>
    %6 = vector.shape_cast %5 : vector<8xf32> to vector<8x1xf32>
    %cst_2 = arith.constant 1.000000e-24 : f32
    %7 = vector.broadcast %cst_2 : f32 to vector<8x1xf32>
    %8 = arith.maximumf %6, %7 : vector<8x1xf32>
    %9 = math.rsqrt %8 : vector<8x1xf32>
    %10 = vector.broadcast %9 : vector<8x1xf32> to vector<8x128xf32>
    %11 = arith.mulf %3, %10 : vector<8x128xf32>
    %c0_3 = arith.constant 0 : index
    %c0_4 = arith.constant 0 : index
    %12 = vector.load %arg6[%c0_3, %c0_4] : memref<128x128xf32, #tpu.memory_space<vmem>>, vector<128x128xf32>
    %cst_5 = arith.constant dense<0.000000e+00> : vector<8x128xf32>
    %13 = tpu.matmul %11, %12, %cst_5 {dimension_numbers = #tpu.dot_dimension_numbers<[1], [0], [0], [1], [0, 0, 1, 1], [], []>} : vector<8x128xf32>, vector<128x128xf32>, vector<8x128xf32> -> vector<8x128xf32>
    %c0_6 = arith.constant 0 : index
    %c0_7 = arith.constant 0 : index
    %14 = vector.load %arg3[%c0_6, %c0_7] : memref<8x1xi32, #tpu.memory_space<vmem>>, vector<8x1xi32>
    %15 = tpu.iota {dimensions = array<i32: 1>} : vector<8x128xi32>
    %16 = vector.broadcast %14 : vector<8x1xi32> to vector<8x128xi32>
    %17 = arith.cmpi eq, %15, %16 : vector<8x128xi32>
    %c8_i32 = arith.constant 8 : i32
    %18 = vector.broadcast %c8_i32 : i32 to vector<8x128xi32>
    %19 = arith.cmpi slt, %15, %18 : vector<8x128xi32>
    %c0_i32_8 = arith.constant 0 : i32
    %20 = vector.broadcast %c0_i32_8 : i32 to vector<8x1xi32>
    %21 = arith.cmpi sge, %14, %20 : vector<8x1xi32>
    %22 = vector.broadcast %21 : vector<8x1xi1> to vector<8x128xi1>
    %23 = arith.andi %19, %22 : vector<8x128xi1>
    %cst_9 = arith.constant 1.000000e-01 : f32
    %24 = vector.broadcast %cst_9 : f32 to vector<8x128xf32>
    %25 = arith.subf %13, %24 : vector<8x128xf32>
    %cst_10 = arith.constant -3.200000e+01 : f32
    %26 = vector.broadcast %cst_10 : f32 to vector<8x128xf32>
    %27 = arith.mulf %26, %25 : vector<8x128xf32>
    %cst_11 = arith.constant 1.000000e-01 : f32
    %28 = vector.broadcast %cst_11 : f32 to vector<8x128xf32>
    %29 = arith.addf %13, %28 : vector<8x128xf32>
    %cst_12 = arith.constant 3.200000e+01 : f32
    %30 = vector.broadcast %cst_12 : f32 to vector<8x128xf32>
    %31 = arith.mulf %30, %29 : vector<8x128xf32>
    %32 = arith.select %17, %27, %31 : vector<8x128xi1>, vector<8x128xf32>
    %cst_13 = arith.constant -1.000000e+30 : f32
    %33 = vector.broadcast %cst_13 : f32 to vector<8x128xf32>
    %34 = arith.select %23, %32, %33 : vector<8x128xi1>, vector<8x128xf32>
    %35 = math.exp %34 : vector<8x128xf32>
    %cst_14 = arith.constant 0.000000e+00 : f32
    %36 = vector.broadcast %cst_14 : f32 to vector<8x128xf32>
    %37 = arith.select %17, %35, %36 : vector<8x128xi1>, vector<8x128xf32>
    %38 = arith.subf %35, %37 : vector<8x128xf32>
    %c0_15 = arith.constant 0 : index
    %c0_16 = arith.constant 0 : index
    %39 = vector.load %arg7[%c0_15, %c0_16] : memref<1x128xf32, #tpu.memory_space<vmem>>, vector<1x128xf32>
    %cst_17 = arith.constant dense<0.000000e+00> : vector<128xf32>
    %40 = vector.multi_reduction <add>, %37, %cst_17 [0] : vector<8x128xf32> to vector<128xf32>
    %41 = vector.shape_cast %40 : vector<128xf32> to vector<1x128xf32>
    %42 = arith.addf %39, %41 : vector<1x128xf32>
    %c0_18 = arith.constant 0 : index
    %c0_19 = arith.constant 0 : index
    %43 = vector.load %arg7[%c0_18, %c0_19] : memref<1x128xf32, #tpu.memory_space<vmem>>, vector<1x128xf32>
    tpu.vector_store %arg7[%c0_18, %c0_19], %42 {strides = array<i32>} : memref<1x128xf32, #tpu.memory_space<vmem>>, vector<1x128xf32>,
    %c0_20 = arith.constant 0 : index
    %c0_21 = arith.constant 0 : index
    %44 = vector.load %arg8[%c0_20, %c0_21] : memref<1x128xf32, #tpu.memory_space<vmem>>, vector<1x128xf32>
    %cst_22 = arith.constant dense<0.000000e+00> : vector<128xf32>
    %45 = vector.multi_reduction <add>, %38, %cst_22 [0] : vector<8x128xf32> to vector<128xf32>
    %46 = vector.shape_cast %45 : vector<128xf32> to vector<1x128xf32>
    %47 = arith.addf %44, %46 : vector<1x128xf32>
    %c0_23 = arith.constant 0 : index
    %c0_24 = arith.constant 0 : index
    %48 = vector.load %arg8[%c0_23, %c0_24] : memref<1x128xf32, #tpu.memory_space<vmem>>, vector<1x128xf32>
    tpu.vector_store %arg8[%c0_23, %c0_24], %47 {strides = array<i32>} : memref<1x128xf32, #tpu.memory_space<vmem>>, vector<1x128xf32>,
    %c0_i32_25 = arith.constant 0 : i32
    %49 = arith.cmpi eq, %arg1, %c0_i32_25 : i32
    %50 = arith.extui %49 : i1 to i32
    %c0_i32_26 = arith.constant 0 : i32
    %51 = arith.cmpi ne, %50, %c0_i32_26 : i32
    scf.if %51 {
      %c0_27 = arith.constant 0 : index
      %c0_28 = arith.constant 0 : index
      %52 = vector.load %arg7[%c0_27, %c0_28] : memref<1x128xf32, #tpu.memory_space<vmem>>, vector<1x128xf32>
      %53 = vector.shape_cast %52 : vector<1x128xf32> to vector<1x1x128xf32>
      %cst_29 = arith.constant dense<0.000000e+00> : vector<1xf32>
      %54 = vector.multi_reduction <add>, %53, %cst_29 [1, 2] : vector<1x1x128xf32> to vector<1xf32>
      %55 = vector.shape_cast %54 : vector<1xf32> to vector<1x1x1xf32>
      %56 = vector.extract %55[0, 0, 0] : f32 from vector<1x1x1xf32>
      %c0_30 = arith.constant 0 : index
      %c0_31 = arith.constant 0 : index
      %57 = vector.load %arg8[%c0_30, %c0_31] : memref<1x128xf32, #tpu.memory_space<vmem>>, vector<1x128xf32>
      %58 = vector.shape_cast %57 : vector<1x128xf32> to vector<1x1x128xf32>
      %cst_32 = arith.constant dense<0.000000e+00> : vector<1xf32>
      %59 = vector.multi_reduction <add>, %58, %cst_32 [1, 2] : vector<1x1x128xf32> to vector<1xf32>
      %60 = vector.shape_cast %59 : vector<1xf32> to vector<1x1x1xf32>
      %61 = vector.extract %60[0, 0, 0] : f32 from vector<1x1x1xf32>
      %62 = tpu.iota {dimensions = array<i32: 0>} : vector<8x128xi32>
      %63 = tpu.iota {dimensions = array<i32: 1>} : vector<8x128xi32>
      %c0_i32_33 = arith.constant 0 : i32
      %64 = vector.broadcast %c0_i32_33 : i32 to vector<8x128xi32>
      %65 = arith.cmpi eq, %62, %64 : vector<8x128xi32>
      %c0_i32_34 = arith.constant 0 : i32
      %66 = vector.broadcast %c0_i32_34 : i32 to vector<8x128xi32>
      %67 = arith.cmpi eq, %63, %66 : vector<8x128xi32>
      %68 = arith.andi %65, %67 : vector<8x128xi1>
      %c0_i32_35 = arith.constant 0 : i32
      %69 = vector.broadcast %c0_i32_35 : i32 to vector<8x128xi32>
      %70 = arith.cmpi eq, %62, %69 : vector<8x128xi32>
      %c1_i32 = arith.constant 1 : i32
      %71 = vector.broadcast %c1_i32 : i32 to vector<8x128xi32>
      %72 = arith.cmpi eq, %63, %71 : vector<8x128xi32>
      %73 = arith.andi %70, %72 : vector<8x128xi1>
      %cst_36 = arith.constant 0.000000e+00 : f32
      %74 = vector.broadcast %61 : f32 to vector<8x128xf32>
      %75 = vector.broadcast %cst_36 : f32 to vector<8x128xf32>
      %76 = arith.select %73, %74, %75 : vector<8x128xi1>, vector<8x128xf32>
      %77 = vector.broadcast %56 : f32 to vector<8x128xf32>
      %78 = arith.select %68, %77, %76 : vector<8x128xi1>, vector<8x128xf32>
      %c0_37 = arith.constant 0 : index
      %c0_38 = arith.constant 0 : index
      %79 = vector.load %arg5[%c0_37, %c0_38] : memref<8x128xf32, #tpu.memory_space<vmem>>, vector<8x128xf32>
      tpu.vector_store %arg5[%c0_37, %c0_38], %78 {strides = array<i32>} : memref<8x128xf32, #tpu.memory_space<vmem>>, vector<8x128xf32>,
    } else {
    }
    return
  }
  func.func @transform_0(%arg0: i32, %arg1: i32) -> (i32, i32) {
    %c1_i32 = arith.constant 1 : i32
    %0 = arith.muli %arg0, %c1_i32 : i32
    %1 = arith.addi %0, %arg1 : i32
    %c0_i32 = arith.constant 0 : i32
    %c0_i32_0 = arith.constant 0 : i32
    return %1, %c0_i32 : i32, i32
  }
  func.func @transform_1(%arg0: i32, %arg1: i32) -> (i32, i32) {
    %c1_i32 = arith.constant 1 : i32
    %0 = arith.muli %arg0, %c1_i32 : i32
    %1 = arith.addi %0, %arg1 : i32
    %c0_i32 = arith.constant 0 : i32
    %c0_i32_0 = arith.constant 0 : i32
    return %1, %c0_i32 : i32, i32
  }
  func.func @transform_3(%arg0: i32, %arg1: i32) -> (i32, i32) {
    %c0_i32 = arith.constant 0 : i32
    %c0_i32_0 = arith.constant 0 : i32
    return %arg0, %c0_i32 : i32, i32
  }
}

</mosaic_0001>

<bundles_post_ra>
// kernel: tpu_custom_call.1
= control target key start
LH: loop header
LB: loop body
LE: loop exit
PB: predicated region body
PF: predicated region fallthrough
CT: control target
= control target key end

     0   :  { %8 = vsyncpa [#allocation7], 0  ;;  %s475_s12 = smov [#allocation2]   ;;  %s582_s0 = inlined_call_operand.vmem [shape: f32[8,128], index: 0, kind: input, shape index: {}]   ;;  %s583_s1 = inlined_call_operand.vmem [shape: s32[8,1], index: 1, kind: input, shape index: {}]   ;;  %s584_s2 = inlined_call_operand.hbm [shape: f32[128,128], index: 2, kind: input, shape index: {}]   ;;  %s585_s3 = inlined_call_operand.hbm [shape: f32[8,128], index: 3, kind: output, shape index: {}]  }
   0x1   :  { %s58_s13 = sshll.u32 %s475_s12, 4  ;;  %s59_s13 = int_to_ptr.vmem [resolvable:$true] %s58_s13 }
   0x2   :  { %s439_s14 = scalar_lea.vmem %s59_s13, 2048  ;;  %p444_p1 = scmp.lt.s32.totalorder %s59_s13, %s59_s13 }
   0x3   :  { %p440_p0 = scmp.ne.s32.totalorder %s59_s13, %s439_s14  ;;  %p445_p2 = scmp.lt.s32.totalorder %s439_s14, %s439_s14 }
   0x5   :  { %p446_p3 = por %p445_p2, %p444_p1 }
   0x7   :  { %p447_p4 = pnand %p446_p3, %p440_p0 }
   0x9   :  { %450 = shalt.err (!%p447_p4)  }
   0xa   :  { %61 = dma.hbm_to_vmem [thread:$0]  %s584_s2, 2048, %s59_s13, [#allocation5] }
   0xb   :  { %471 = dma.done.wait [#allocation5], 2048 }
   0xc   :  { %472 = vsyncadd [#allocation5], 4294965248  ;;  %v476_v0 = vmov 0.0   ;;  %v509_v1 = vld [vmem:[%s582_s0] sm:$0xff]  ;;  %v513_v3 = vld [vmem:[#allocation2 + $0x8] sm:$0xff]  ;;  %vm477_vm0 = vmmov 0  }
   0xd   :  { %379 = vmatprep.subr.mxu0 %v476_v0  ;;  %152 = vst [vmem:[#allocation3] sm:$0x1] %v476_v0  ;;  %153 = vst [vmem:[#allocation4] sm:$0x1] %v476_v0  ;;  %v511_v2 = vld [vmem:[#allocation2] sm:$0xff]  ;;  %v155_v4 = vmul.f32 %v509_v1, %v509_v1  ;;  %v517_v5 = vld [vmem:[#allocation2 + $0x10] sm:$0xff]  ;;  %v82_v8 = vmul.f32 %v513_v3, %v513_v3  ;;  %411 = vmatprep.mubr.msk.f32.mxu0 %vm477_vm0, %v476_v0 }
   0xe   :  { %v519_v6 = vld [vmem:[#allocation2 + $0x18] sm:$0xff]  ;;  %v81_v7 = vmul.f32 %v511_v2, %v511_v2  ;;  %v525_v9 = vld [vmem:[#allocation2 + $0x20] sm:$0xff]  ;;  %v83_v10 = vmul.f32 %v517_v5, %v517_v5  ;;  %v531_v13 = vld [vmem:[#allocation2 + $0x28] sm:$0xff]  ;;  %v478_v51 = vmov 0   ;;  %vm294_vm6 = vcmask 1040384   ;;  %s479_s19 = smov [#allocation6]  }
   0xf   :  { %156 = vadd.xlane.f32.xlu0 %v155_v4  ;;  %v84_v11 = vmul.f32 %v519_v6, %v519_v6  ;;  %v85_v14 = vmul.f32 %v525_v9, %v525_v9  ;;  %v535_v16 = vld [vmem:[#allocation2 + $0x30] sm:$0xff]  ;;  %v86_v17 = vmul.f32 %v531_v13, %v531_v13  ;;  %v539_v19 = vld [vmem:[#allocation2 + $0x38] sm:$0xff]  ;;  %v73_v22 = vld [vmem:[#allocation2 + $0x40] sm:$0xff]  ;;  %424 = vset.pattern.permute.xlu1 %v478_v51  ;;  %s334_s20 = sshll.u32 %s479_s19, 4  ;;  %s335_s20 = int_to_ptr.vmem [resolvable:$true] %s334_s20 }
  0x10   :  { %v97_v12 = vadd.f32 %v82_v8, %v81_v7  ;;  %v87_v20 = vmul.f32 %v535_v16, %v535_v16  ;;  %v88_v23 = vmul.f32 %v539_v19, %v539_v19  ;;  %v74_v25 = vld [vmem:[#allocation2 + $0x48] sm:$0xff]  ;;  %v89_v26 = vmul.f32 %v73_v22, %v73_v22  ;;  %v75_v28 = vld [vmem:[#allocation2 + $0x50] sm:$0xff]  ;;  %v76_v31 = vld [vmem:[#allocation2 + $0x58] sm:$0xff]  ;;  %423 = vset.pattern.permute.xlu0 %v478_v51  ;;  %s451_s22 = scalar_lea.vmem %s335_s20, 128  ;;  %p456_p6 = scmp.lt.s32.totalorder %s335_s20, %s335_s20 }
  0x11   :  { %v90_v29 = vmul.f32 %v74_v25, %v74_v25  ;;  %v91_v32 = vmul.f32 %v75_v28, %v75_v28  ;;  %v77_v34 = vld [vmem:[#allocation2 + $0x60] sm:$0xff]  ;;  %v92_v35 = vmul.f32 %v76_v31, %v76_v31  ;;  %v78_v37 = vld [vmem:[#allocation2 + $0x68] sm:$0xff]  ;;  %v79_v40 = vld [vmem:[#allocation2 + $0x70] sm:$0xff]  ;;  %p452_p5 = scmp.ne.s32.totalorder %s335_s20, %s451_s22  ;;  %p457_p7 = scmp.lt.s32.totalorder %s451_s22, %s451_s22 }
  0x12   :  { %v98_v15 = vadd.f32 %v97_v12, %v83_v10  ;;  %v93_v38 = vmul.f32 %v77_v34, %v77_v34  ;;  %v94_v41 = vmul.f32 %v78_v37, %v78_v37  ;;  %v80_v43 = vld [vmem:[#allocation2 + $0x78] sm:$0xff]  ;;  %v95_v44 = vmul.f32 %v79_v40, %v79_v40  ;;  %v247_v50 = vld [vmem:[%s583_s1] sm:$0xff] }
  0x13   :  { %v96_v46 = vmul.f32 %v80_v43, %v80_v43  ;;  %vm255_vm1 = vcmp.ge.s32.totalorder %v247_v50, 0  ;;  %p458_p8 = por %p457_p7, %p456_p6 }
  0x14   :  { %v99_v18 = vadd.f32 %v98_v15, %v84_v11  ;;  %v256_v53 = vsel %vm255_vm1, 1, %v478_v51 }
  0x15   :  { %258 = vperm.xlu1 %424, %v256_v53   ;;  %p459_p9 = pnand %p458_p8, %p452_p5 }
  0x16   :  { %v100_v21 = vadd.f32 %v99_v18, %v85_v14 }
  0x18   :  { %v101_v24 = vadd.f32 %v100_v21, %v86_v17 }
  0x1a   :  { %v102_v27 = vadd.f32 %v101_v24, %v87_v20 }
  0x1c   :  { %v103_v30 = vadd.f32 %v102_v27, %v88_v23 }
  0x1e   :  { %v104_v33 = vadd.f32 %v103_v30, %v89_v26 }
  0x20   :  { %v105_v36 = vadd.f32 %v104_v33, %v90_v29 }
  0x22   :  { %v106_v39 = vadd.f32 %v105_v36, %v91_v32 }
  0x24   :  { %v107_v42 = vadd.f32 %v106_v39, %v92_v35 }
  0x25   :  { %251 = vperm.xlu0 %423, %v247_v50  }
  0x26   :  { %v108_v45 = vadd.f32 %v107_v42, %v93_v38  ;;  %v272_v42 = vld [vmem:[#allocation3] sm:$0x1] }
  0x28   :  { %v109_v47 = vadd.f32 %v108_v45, %v94_v41  ;;  %v281_v45 = vld [vmem:[#allocation4] sm:$0x1] }
  0x2a   :  { %v110_v48 = vadd.f32 %v109_v47, %v95_v44 }
  0x2c   :  { %v111_v49 = vadd.f32 %v110_v48, %v96_v46 }
  0x2e   :  { %v112_v52 = vrot.slane %v111_v49, 4 }
  0x30   :  { %v113_v54 = vadd.f32 %v112_v52, %v111_v49 }
  0x32   :  { %v114_v55 = vrot.slane %v113_v54, 2 }
  0x34   :  { %v115_v56 = vadd.f32 %v114_v55, %v113_v54 }
  0x36   :  { %v116_v57 = vrot.slane %v115_v56, 1 }
  0x38   :  { %v117_v58 = vadd.f32 %v116_v57, %v115_v56 }
  0x3a   :  { %v118_v59 = vmax.f32 %v117_v58, 1e-24 }
  0x3c   :  { %425 = vrsqrt.f32 %v118_v59 }
  0x49   :  { %v426_v60 = vpop.eup %425 }
  0x4a   :  { %v135_v61 = vmul.f32 %v426_v60, %v80_v43  ;;  %v134_v62 = vmul.f32 %v426_v60, %v79_v40  ;;  %v133_v63 = vmul.f32 %v426_v60, %v78_v37  ;;  %v132_v4 = vmul.f32 %v426_v60, %v77_v34 }
  0x4b   :  { %v131_v7 = vmul.f32 %v426_v60, %v76_v31  ;;  %v130_v8 = vmul.f32 %v426_v60, %v75_v28  ;;  %v129_v10 = vmul.f32 %v426_v60, %v74_v25  ;;  %v128_v11 = vmul.f32 %v426_v60, %v73_v22 }
  0x4c   :  { %151 = vst [vmem:[#allocation2 + $0x78] sm:$0xff] %v135_v61  ;;  %380 = vmatpush3.msra.mxu0 %v135_v61  ;;  %150 = vst [vmem:[#allocation2 + $0x70] sm:$0xff] %v134_v62  ;;  %v127_v12 = vmul.f32 %v426_v60, %v539_v19  ;;  %v126_v14 = vmul.f32 %v426_v60, %v535_v16  ;;  %v125_v15 = vmul.f32 %v426_v60, %v531_v13 }
  0x4d   :  { %149 = vst [vmem:[#allocation2 + $0x68] sm:$0xff] %v133_v63  ;;  %148 = vst [vmem:[#allocation2 + $0x60] sm:$0xff] %v132_v4  ;;  %v124_v17 = vmul.f32 %v426_v60, %v525_v9  ;;  %381 = vmatprep.subr.mxu0 %v476_v0  ;;  %v123_v18 = vmul.f32 %v426_v60, %v519_v6  ;;  %v122_v20 = vmul.f32 %v426_v60, %v517_v5  ;;  %v248_v9 = vlaneseq }
  0x4e   :  { %147 = vst [vmem:[#allocation2 + $0x58] sm:$0xff] %v131_v7  ;;  %146 = vst [vmem:[#allocation2 + $0x50] sm:$0xff] %v130_v8  ;;  %v121_v21 = vmul.f32 %v426_v60, %v513_v3  ;;  %v120_v19 = vmul.f32 %v426_v60, %v511_v2  ;;  %382 = vmatpush3.msra.mxu0 %v134_v62 }
  0x4f   :  { %145 = vst [vmem:[#allocation2 + $0x48] sm:$0xff] %v129_v10  ;;  %144 = vst [vmem:[#allocation2 + $0x40] sm:$0xff] %v128_v11  ;;  %383 = vmatprep.subr.mxu0 %v476_v0  ;;  %v573_v13 = vand.u32 127, %v248_v9 }
  0x50   :  { %143 = vst [vmem:[#allocation2 + $0x38] sm:$0xff] %v127_v12  ;;  %142 = vst [vmem:[#allocation2 + $0x30] sm:$0xff] %v126_v14  ;;  %384 = vmatpush3.msra.mxu0 %v133_v63 }
  0x51   :  { %141 = vst [vmem:[#allocation2 + $0x28] sm:$0xff] %v125_v15  ;;  %140 = vst [vmem:[#allocation2 + $0x20] sm:$0xff] %v124_v17  ;;  %385 = vmatprep.subr.mxu0 %v476_v0  ;;  %vm254_vm2 = vcmp.lt.s32.totalorder %v573_v13, 8  ;;  %vm321_vm8 = vcmp.eq.s32.totalorder %v573_v13, 1  ;;  %vm319_vm9 = vcmp.eq.s32.totalorder %v573_v13, 0 }
  0x52   :  { %139 = vst [vmem:[#allocation2 + $0x18] sm:$0xff] %v123_v18  ;;  %138 = vst [vmem:[#allocation2 + $0x10] sm:$0xff] %v122_v20  ;;  %386 = vmatpush3.msra.mxu0 %v132_v4 }
  0x53   :  { %137 = vst [vmem:[#allocation2 + $0x8] sm:$0xff] %v121_v21  ;;  %136 = vst [vmem:[#allocation2] sm:$0xff] %v120_v19  ;;  %387 = vmatprep.subr.mxu0 %v476_v0 }
  0x54   :  { %388 = vmatpush3.msra.mxu0 %v131_v7 }
  0x55   :  { %389 = vmatprep.subr.mxu0 %v476_v0 }
  0x56   :  { %390 = vmatpush3.msra.mxu0 %v130_v8 }
  0x57   :  { %391 = vmatprep.subr.mxu0 %v476_v0 }
  0x58   :  { %392 = vmatpush3.msra.mxu0 %v129_v10  ;;  %v317_v10 = vshrl.u32 %v248_v9, 7 }
  0x59   :  { %393 = vmatprep.subr.mxu0 %v476_v0 }
  0x5a   :  { %394 = vmatpush3.msra.mxu0 %v128_v11  ;;  %vm318_vm7 = vcmp.eq.s32.totalorder %v317_v10, 0 }
  0x5b   :  { %395 = vmatprep.subr.mxu0 %v476_v0  ;;  %vm322_vm10 = vmand %vm318_vm7, %vm321_vm8 }
  0x5c   :  { %396 = vmatpush3.msra.mxu0 %v127_v12  ;;  %vm320_vm11 = vmand %vm318_vm7, %vm319_vm9 }
  0x5d   :  { %397 = vmatprep.subr.mxu0 %v476_v0 }
  0x5e   :  { %398 = vmatpush3.msra.mxu0 %v126_v14 }
  0x5f   :  { %399 = vmatprep.subr.mxu0 %v476_v0 }
  0x60   :  { %400 = vmatpush3.msra.mxu0 %v125_v15 }
  0x61   :  { %401 = vmatprep.subr.mxu0 %v476_v0 }
  0x62   :  { %402 = vmatpush3.msra.mxu0 %v124_v17 }
  0x63   :  { %403 = vmatprep.subr.mxu0 %v476_v0 }
  0x64   :  { %404 = vmatpush3.msra.mxu0 %v123_v18 }
  0x65   :  { %405 = vmatprep.subr.mxu0 %v476_v0 }
  0x66   :  { %406 = vmatpush3.msra.mxu0 %v122_v20 }
  0x67   :  { %407 = vmatprep.subr.mxu0 %v476_v0 }
  0x68   :  { %408 = vmatpush3.msra.mxu0 %v121_v21 }
  0x69   :  { %409 = vmatprep.subr.mxu0 %v476_v0 }
  0x6a   :  { %410 = vmatpush3.msra.mxu0 %v120_v19 }
  0x90   :  { %v259_v16 = vpop.permute.xlu1 %258 }
  0x91   :  { %vm260_vm3 = vcmp.eq.s32.totalorder %v259_v16, 1 }
  0x92   :  { %vm261_vm5 = vmand %vm254_vm2, %vm260_vm3 }
  0x98   :  { %v157_v2 = vpop.xlane.xlu0 %156 }
  0x99   :  { %v158_v3 = vmax.f32 %v157_v2, 1e-24 }
  0x9b   :  { %427 = vrsqrt.f32 %v158_v3 }
  0xa0   :  { %v252_v22 = vpop.permute.xlu0 %251 }
  0xa1   :  { %vm253_vm4 = vcmp.eq.s32.totalorder %v573_v13, %v252_v22 }
  0xa8   :  { %v428_v5 = vpop.eup %427 }
  0xa9   :  { %v160_v6 = vmul.f32 %v428_v5, %v509_v1 }
  0xab   :  { %412 = vmatmul.mubr.f32.vlgmr.msra.gmra.mxu0 %v160_v6 }
 0x16b   :  { %v243_v23 = vpop.f32.mrf.mxu0 }
 0x16c   :  { %v360_v24 = vadd.f32 -0.1, %v243_v23  ;;  %v264_v25 = vadd.f32 0.1, %v243_v23 }
 0x16d   :  { %v413_v0 = vpop.f32.mrf.mxu0 }
 0x16e   :  { %v263_v26 = vmul.f32 -32.0, %v360_v24  ;;  %v265_v27 = vmul.f32 32.0, %v264_v25 }
 0x170   :  { %v266_v28 = vsel %vm253_vm4, %v263_v26, %v265_v27 }
 0x171   :  { %v267_v1 = vsel %vm261_vm5, %v266_v28, -1e+30 }
 0x172   :  { %v268_v29 = vmul.f32 1.442695, %v267_v1 }
 0x174   :  { %429 = vpow2.f32 %v268_v29 }
 0x181   :  { %v430_v30 = vpop.eup %429 }
 0x182   :  { %v270_v31 = vsel %vm253_vm4, %v430_v30, 0.0 }
 0x183   :  { %v271_v32 = vsub.f32 %v430_v30, %v270_v31  ;;  %v273_v33 = vrot.slane %v270_v31, 4 }
 0x185   :  { %v274_v34 = vadd.f32 %v273_v33, %v270_v31  ;;  %v282_v35 = vrot.slane %v271_v32, 4 }
 0x187   :  { %v275_v36 = vrot.slane %v274_v34, 2  ;;  %v283_v37 = vadd.f32 %v282_v35, %v271_v32 }
 0x189   :  { %v276_v38 = vadd.f32 %v275_v36, %v274_v34  ;;  %v284_v39 = vrot.slane %v283_v37, 2 }
 0x18b   :  { %v277_v40 = vrot.slane %v276_v38, 1  ;;  %v285_v41 = vadd.f32 %v284_v39, %v283_v37 }
 0x18d   :  { %v278_v43 = vadd.f32 %v277_v40, %v276_v38  ;;  %v286_v44 = vrot.slane %v285_v41, 1 }
 0x18f   :  { %v279_v46 = vadd.f32 %v278_v43, %v272_v42  ;;  %v287_v47 = vadd.f32 %v286_v44, %v285_v41 }
 0x191   :  { %280 = vst [vmem:[#allocation3] sm:$0x1] %v279_v46  ;;  %v288_v48 = vadd.f32 %v287_v47, %v281_v45 }
 0x193   :  { %289 = vst [vmem:[#allocation4] sm:$0x1] %v288_v48 }
 0x198   :  { %v293_v49 = vld [vmem:[#allocation3] sm:$0x1] }
 0x199   :  { %v295_v50 = vsel %vm294_vm6, %v293_v49, 0.0 }
 0x19a   :  { %296 = vadd.xlane.f32.xlu1 %v295_v50  ;;  %v305_v51 = vld [vmem:[#allocation4] sm:$0x1] }
 0x19b   :  { %v306_v52 = vsel %vm294_vm6, %v305_v51, 0.0 }
 0x19e   :  { %307 = vadd.xlane.f32.xlu1 %v306_v52 }
 0x223   :  { %v297_v53 = vpop.xlane.xlu1 %296 }
 0x224   :  { %v298_v54 = vrot.slane %v297_v53, 4 }
 0x226   :  { %v299_v55 = vadd.f32 %v298_v54, %v297_v53 }
 0x227   :  { %v308_v56 = vpop.xlane.xlu1 %307 }
 0x228   :  { %v300_v57 = vrot.slane %v299_v55, 2  ;;  %v309_v58 = vrot.slane %v308_v56, 4 }
 0x22a   :  { %v310_v59 = vadd.f32 %v309_v58, %v308_v56  ;;  %v301_v60 = vadd.f32 %v300_v57, %v299_v55 }
 0x22c   :  { %v311_v61 = vrot.slane %v310_v59, 2  ;;  %v302_v62 = vrot.slane %v301_v60, 1 }
 0x22e   :  { %v312_v63 = vadd.f32 %v311_v61, %v310_v59  ;;  %v303_v4 = vadd.f32 %v302_v62, %v301_v60 }
 0x230   :  { %414 = vpush %v303_v4  ;;  %v313_v7 = vrot.slane %v312_v63, 1 }
 0x232   :  { %v314_v8 = vadd.f32 %v313_v7, %v312_v63 }
 0x234   :  { %416 = vpush %v314_v8 }
 0x261   :  { %s415_s1 = spop %414 }
 0x262   :  { %v325_v12 = vstv %s415_s1 }
 0x265   :  { %s417_s21 = spop %416 }
 0x266   :  { %v323_v11 = vstv %s417_s21 }
 0x267   :  { %v324_v14 = vsel %vm322_vm10, %v323_v11, 0.0 }
 0x268   :  { %v326_v15 = vsel %vm320_vm11, %v325_v12, %v324_v14 }
 0x269   :  { %327 = vst [vmem:[#allocation6] sm:$0xff] %v326_v15 }
 0x26a   :  { %462 = shalt.err (!%p459_p9)
}
 0x26b   :  { %337 = dma.vmem_to_hbm [thread:$0]  %s335_s20, 128, %s585_s3, [#allocation7]  }
 0x26c   :  { %473 = dma.done.wait [#allocation7], 128  }
 0x26d   :  { %474 = vsyncadd [#allocation7], 4294967168 }
 0x26e   :  { %341 = vsyncpa [#allocation7], 1 }
 0x26f   :  { %342 = vsyncmov [#allocation5] }
 0x272   :  { %s343_s25 = vpop.sfrf %342 }
 0x273   :  { %p361_p10 = scmp.ne.s32.totalorder %s343_s25, 0 }
 0x275   :  { %347 = shalt.err (%p361_p10)  }

</bundles_post_ra>
